<compile_context>
chip_gen: v5e
topology: v5e:2x2
jax: 0.10.0
libtpu: 0.0.40
codegen_flags: <defaults>
</compile_context>

<pallas_src>
import jax
import jax.numpy as jnp
from jax.experimental import pallas as pl
from jax.experimental.pallas import tpu as pltpu

NUM_HEADS = 38
FEAT_DIM = 2048
HEAD_CLASSES = 2
OUT_DIM = NUM_HEADS * HEAD_CLASSES  # 76
N_PAD = 128                         # lane-dense padded output width
MAX_TB = 512                        # max batch-tile rows


def _round_up(x, m):
    return ((x + m - 1) // m) * m


def _multihead_kernel(feat_ref, w_ref, b_ref, out_ref):
    """One batch tile: (TB, 2048) @ (2048, 128) + bias -> (TB, 128)."""
    out_ref[...] = (
        jnp.dot(feat_ref[...], w_ref[...], preferred_element_type=jnp.float32)
        + b_ref[...]
    ).astype(out_ref.dtype)


def multihead_heads_pallas(feat, w, b):
    """feat: (B, 2048) f32, w: (2048, 76) f32, b: (1, 76) f32 -> (B, 76) f32."""
    B, K = feat.shape
    assert K == FEAT_DIM
    N = w.shape[1]
    assert N == OUT_DIM

    # Pad N to 128 for lane-dense (unmasked) stores and full MXU lane use.
    w_p = jnp.pad(w, ((0, 0), (0, N_PAD - N)))
    b_p = jnp.pad(b.reshape(1, N), ((0, 0), (0, N_PAD - N)))

    # Batch tiling: tile <= MAX_TB rows, padded to a multiple of 8 (sublane).
    if B <= MAX_TB:
        tb = _round_up(B, 8)
        bp = tb
    else:
        tb = MAX_TB
        bp = _round_up(B, tb)
    feat_p = jnp.pad(feat, ((0, bp - B), (0, 0)))

    cost = pl.CostEstimate(
        flops=2 * bp * K * N_PAD,
        transcendentals=0,
        bytes_accessed=4 * (bp * K + K * N_PAD + N_PAD + bp * N_PAD),
    )

    out_p = pl.pallas_call(
        _multihead_kernel,
        out_shape=jax.ShapeDtypeStruct((bp, N_PAD), feat.dtype),
        grid_spec=pltpu.PrefetchScalarGridSpec(
            num_scalar_prefetch=0,
            grid=(bp // tb,),
            in_specs=[
                pl.BlockSpec((tb, K), lambda i: (i, 0)),       # feature tile
                pl.BlockSpec((K, N_PAD), lambda i: (0, 0)),    # weight (resident)
                pl.BlockSpec((1, N_PAD), lambda i: (0, 0)),    # bias (resident)
            ],
            out_specs=pl.BlockSpec((tb, N_PAD), lambda i: (i, 0)),
        ),
        compiler_params=pltpu.CompilerParams(
            dimension_semantics=("parallel",),
        ),
        cost_estimate=cost,
    )(feat_p, w_p, b_p)

    return out_p[:B, :N]


def multihead_forward(feat, w, b):
    """Replicates multihead.forward semantics given backbone features.

    Returns (stack, 0) where stack has shape (B, 38, 2), matching
    torch.stack(vecs, 0).permute(1, 0, 2).
    """
    flat = multihead_heads_pallas(feat, w, b)          # (B, 76)
    stack = flat.reshape(feat.shape[0], NUM_HEADS, HEAD_CLASSES)
    return stack, 0


def init_params(key):
    """Deterministic stand-in for the 38 nn.Linear(2048, 2) heads."""
    kw, kb = jax.random.split(key)
    # per-head weights: (38, 2, 2048), biases: (38, 2) -- like PyTorch Linear
    bound = 1.0 / jnp.sqrt(FEAT_DIM)
    w_heads = jax.random.uniform(
        kw, (NUM_HEADS, HEAD_CLASSES, FEAT_DIM), jnp.float32, -bound, bound
    )
    b_heads = jax.random.uniform(
        kb, (NUM_HEADS, HEAD_CLASSES), jnp.float32, -bound, bound
    )
    # combine into one (2048, 76) matmul: column h*2+c == weight_h[c, :]
    w = jnp.transpose(w_heads, (2, 0, 1)).reshape(FEAT_DIM, OUT_DIM)
    b = b_heads.reshape(1, OUT_DIM)
    return w, b, w_heads, b_heads


if __name__ == "__main__":
    key = jax.random.PRNGKey(0)
    kfeat, kparam = jax.random.split(key)

    B = 2
    # Backbone features (stand-in for resnet101 output); see TODO(synk) above.
    feat = jax.random.normal(kfeat, (B, FEAT_DIM), jnp.float32)
    w, b, w_heads, b_heads = init_params(kparam)

    stack, zero = multihead_forward(feat, w, b)
    stack = jax.block_until_ready(stack)

    # Reference: explicit loop over the 38 heads, exactly like the PyTorch code.
    ref = jnp.stack(
        [feat @ w_heads[h].T + b_heads[h] for h in range(NUM_HEADS)], axis=0
    ).transpose(1, 0, 2)

    assert stack.shape == (B, NUM_HEADS, HEAD_CLASSES), stack.shape
    assert zero == 0
    assert jnp.allclose(stack, ref, atol=1e-4, rtol=1e-4)
    print("KERNEL_OK")
</pallas_src>

<mosaic_0001>
module attributes {stable_mosaic.version = 11 : i64} {
  func.func @_multihead_kernel(%arg0: i32, %arg1: memref<8x2048xf32, #tpu.memory_space<vmem>>, %arg2: memref<2048x128xf32, #tpu.memory_space<vmem>>, %arg3: memref<1x128xf32, #tpu.memory_space<vmem>>, %arg4: memref<8x128xf32, #tpu.memory_space<vmem>>) attributes {dimension_semantics = [#tpu.dimension_semantics<parallel>], iteration_bounds = array<i64: 1>, scalar_prefetch = 0 : i64, scratch_operands = 0 : i64, tpu.core_type = #tpu.core_type<tc>, window_params = [{transform_indices = @transform_0, window_bounds = array<i64: 8, 2048>}, {pipeline_mode = #tpu.pipeline_mode<synchronous>, transform_indices = @transform_1, window_bounds = array<i64: 2048, 128>}, {pipeline_mode = #tpu.pipeline_mode<synchronous>, transform_indices = @transform_2, window_bounds = array<i64: 1, 128>}, {transform_indices = @transform_3, window_bounds = array<i64: 8, 128>}]} {
    %c0 = arith.constant 0 : index
    %c0_0 = arith.constant 0 : index
    %0 = vector.load %arg1[%c0, %c0_0] : memref<8x2048xf32, #tpu.memory_space<vmem>>, vector<8x2048xf32>
    %c0_1 = arith.constant 0 : index
    %c0_2 = arith.constant 0 : index
    %1 = vector.load %arg2[%c0_1, %c0_2] : memref<2048x128xf32, #tpu.memory_space<vmem>>, vector<2048x128xf32>
    %cst = arith.constant dense<0.000000e+00> : vector<8x128xf32>
    %2 = tpu.matmul %0, %1, %cst {dimension_numbers = #tpu.dot_dimension_numbers<[1], [0], [0], [1], [0, 0, 1, 1], [], []>} : vector<8x2048xf32>, vector<2048x128xf32>, vector<8x128xf32> -> vector<8x128xf32>
    %c0_3 = arith.constant 0 : index
    %c0_4 = arith.constant 0 : index
    %3 = vector.load %arg3[%c0_3, %c0_4] : memref<1x128xf32, #tpu.memory_space<vmem>>, vector<1x128xf32>
    %4 = vector.broadcast %3 : vector<1x128xf32> to vector<8x128xf32>
    %5 = arith.addf %2, %4 : vector<8x128xf32>
    %c0_5 = arith.constant 0 : index
    %c0_6 = arith.constant 0 : index
    %6 = vector.load %arg4[%c0_5, %c0_6] : memref<8x128xf32, #tpu.memory_space<vmem>>, vector<8x128xf32>
    tpu.vector_store %arg4[%c0_5, %c0_6], %5 {strides = array<i32>} : memref<8x128xf32, #tpu.memory_space<vmem>>, vector<8x128xf32>,
    return
  }
  func.func @transform_0(%arg0: i32) -> (i32, i32) {
    %c0_i32 = arith.constant 0 : i32
    %c0_i32_0 = arith.constant 0 : i32
    return %arg0, %c0_i32 : i32, i32
  }
  func.func @transform_1(%arg0: i32) -> (i32, i32) {
    %c0_i32 = arith.constant 0 : i32
    %c0_i32_0 = arith.constant 0 : i32
    %c0_i32_1 = arith.constant 0 : i32
    return %c0_i32, %c0_i32_0 : i32, i32
  }
  func.func @transform_2(%arg0: i32) -> (i32, i32) {
    %c0_i32 = arith.constant 0 : i32
    %c0_i32_0 = arith.constant 0 : i32
    %c0_i32_1 = arith.constant 0 : i32
    return %c0_i32, %c0_i32_0 : i32, i32
  }
  func.func @transform_3(%arg0: i32) -> (i32, i32) {
    %c0_i32 = arith.constant 0 : i32
    %c0_i32_0 = arith.constant 0 : i32
    return %arg0, %c0_i32 : i32, i32
  }
}

</mosaic_0001>

<bundles_post_ra>
// kernel: tpu_custom_call.1
= control target key start
LH: loop header
LB: loop body
LE: loop exit
PB: predicated region body
PF: predicated region fallthrough
CT: control target
= control target key end

     0   :  { %8 = vsyncpa [#allocation3], 0  ;;  %s781_s0 = inlined_call_operand.hbm [shape: f32[8,2048], index: 0, kind: input, shape index: {}]   ;;  %s782_s1 = inlined_call_operand.hbm [shape: f32[2048,128], index: 1, kind: input, shape index: {}]   ;;  %s783_s2 = inlined_call_operand.vmem [shape: f32[1,128], index: 2, kind: input, shape index: {}]   ;;  %s784_s3 = inlined_call_operand.hbm [shape: f32[8,128], index: 3, kind: output, shape index: {}]  }
   0x1   :  { %9 = vsyncpa [#allocation6], 0 }
   0x2   :  { %10 = vsyncpa [#allocation4], 0  ;;  %s16_s14 = sshll.u32 %s781_s0, 4  ;;  %s744_s15 = smov [#allocation2]   ;;  %s17_s14 = int_to_ptr.hbm [resolvable:$true] %s16_s14 }
   0x3   :  { %s18_s16 = sshll.u32 %s744_s15, 4  ;;  %s26_s19 = sshll.u32 %s782_s1, 4  ;;  %s19_s16 = int_to_ptr.vmem [resolvable:$true] %s18_s16  ;;  %s27_s19 = int_to_ptr.hbm [resolvable:$true] %s26_s19 }
   0x4   :  { %21 = dma.hbm_to_vmem [thread:$0]  %s17_s14, 2048, %s19_s16, [#allocation3]  }
   0x5   :  { %s745_s20 = smov [#allocation5]   ;;  %s746_s22 = smov 128  }
   0x6   :  { %s28_s21 = sshll.u32 %s745_s20, 4  ;;  %s747_s23 = smov 8   ;;  %s29_s21 = int_to_ptr.vmem [resolvable:$true] %s28_s21 }
   0x7   :  { %34 = dma.hbm_to_vmem [thread:$0]  %s27_s19, 32768, %s29_s21, [#allocation6], %s746_s22, %s746_s22, %s747_s23  }
   0x8   :  { %738 = dma.done.wait [#allocation3], 2048  }
   0x9   :  { %739 = vsyncadd [#allocation3], 4294965248 }
   0xa   :  { %740 = dma.done.wait [#allocation6], 32768  }
   0xb   :  { %741 = vsyncadd [#allocation6], 4294934528  ;;  %v76_v0 = vld [vmem:[#allocation5 + $0x78] sm:$0xff]  ;;  %v75_v2 = vld [vmem:[#allocation5 + $0x70] sm:$0xff]  ;;  %s649_s27 = sshll.u32 %s784_s3, 4  ;;  %s650_s27 = int_to_ptr.hbm [resolvable:$true] %s649_s27 }
   0xc   :  { %v108_v1 = vld [vmem:[#allocation5 + $0x178] sm:$0xff]  ;;  %321 = vmatpush.msra.mxu0 %v76_v0  ;;  %v107_v4 = vld [vmem:[#allocation5 + $0x170] sm:$0xff]  ;;  %v74_v6 = vld [vmem:[#allocation5 + $0x68] sm:$0xff] }
   0xd   :  { %361 = vmatpush.msra.mxu2 %v108_v1  ;;  %v92_v3 = vld [vmem:[#allocation5 + $0xf8] sm:$0xff]  ;;  %v91_v7 = vld [vmem:[#allocation5 + $0xf0] sm:$0xff]  ;;  %v106_v8 = vld [vmem:[#allocation5 + $0x168] sm:$0xff] }
   0xe   :  { %v124_v5 = vld [vmem:[#allocation5 + $0x1f8] sm:$0xff]  ;;  %341 = vmatpush.msra.mxu1 %v92_v3  ;;  %322 = vmatpush.msra.mxu0 %v75_v2  ;;  %v123_v9 = vld [vmem:[#allocation5 + $0x1f0] sm:$0xff]  ;;  %v90_v10 = vld [vmem:[#allocation5 + $0xe8] sm:$0xff] }
   0xf   :  { %381 = vmatpush.msra.mxu3 %v124_v5  ;;  %362 = vmatpush.msra.mxu2 %v107_v4  ;;  %v73_v11 = vld [vmem:[#allocation5 + $0x60] sm:$0xff]  ;;  %v122_v13 = vld [vmem:[#allocation5 + $0x1e8] sm:$0xff]  ;;  %v72_v16 = vld [vmem:[#allocation5 + $0x58] sm:$0xff] }
  0x10   :  { %342 = vmatpush.msra.mxu1 %v91_v7  ;;  %v105_v12 = vld [vmem:[#allocation5 + $0x160] sm:$0xff]  ;;  %323 = vmatpush.msra.mxu0 %v74_v6  ;;  %v104_v17 = vld [vmem:[#allocation5 + $0x158] sm:$0xff]  ;;  %v71_v20 = vld [vmem:[#allocation5 + $0x50] sm:$0xff] }
  0x11   :  { %382 = vmatpush.msra.mxu3 %v123_v9  ;;  %363 = vmatpush.msra.mxu2 %v106_v8  ;;  %v89_v14 = vld [vmem:[#allocation5 + $0xe0] sm:$0xff]  ;;  %v88_v18 = vld [vmem:[#allocation5 + $0xd8] sm:$0xff]  ;;  %v103_v21 = vld [vmem:[#allocation5 + $0x150] sm:$0xff] }
  0x12   :  { %v121_v15 = vld [vmem:[#allocation5 + $0x1e0] sm:$0xff]  ;;  %343 = vmatpush.msra.mxu1 %v90_v10  ;;  %324 = vmatpush.msra.mxu0 %v73_v11  ;;  %v120_v19 = vld [vmem:[#allocation5 + $0x1d8] sm:$0xff]  ;;  %v87_v22 = vld [vmem:[#allocation5 + $0xd0] sm:$0xff] }
  0x13   :  { %383 = vmatpush.msra.mxu3 %v122_v13  ;;  %364 = vmatpush.msra.mxu2 %v105_v12  ;;  %v119_v23 = vld [vmem:[#allocation5 + $0x1d0] sm:$0xff]  ;;  %v70_v24 = vld [vmem:[#allocation5 + $0x48] sm:$0xff]  ;;  %v69_v28 = vld [vmem:[#allocation5 + $0x40] sm:$0xff] }
  0x14   :  { %344 = vmatpush.msra.mxu1 %v89_v14  ;;  %325 = vmatpush.msra.mxu0 %v72_v16  ;;  %v102_v25 = vld [vmem:[#allocation5 + $0x148] sm:$0xff]  ;;  %v101_v29 = vld [vmem:[#allocation5 + $0x140] sm:$0xff]  ;;  %v68_v32 = vld [vmem:[#allocation5 + $0x38] sm:$0xff] }
  0x15   :  { %384 = vmatpush.msra.mxu3 %v121_v15  ;;  %365 = vmatpush.msra.mxu2 %v104_v17  ;;  %v86_v26 = vld [vmem:[#allocation5 + $0xc8] sm:$0xff]  ;;  %v85_v30 = vld [vmem:[#allocation5 + $0xc0] sm:$0xff]  ;;  %v100_v33 = vld [vmem:[#allocation5 + $0x138] sm:$0xff] }
  0x16   :  { %345 = vmatpush.msra.mxu1 %v88_v18  ;;  %326 = vmatpush.msra.mxu0 %v71_v20  ;;  %v118_v27 = vld [vmem:[#allocation5 + $0x1c8] sm:$0xff]  ;;  %v117_v31 = vld [vmem:[#allocation5 + $0x1c0] sm:$0xff]  ;;  %v84_v34 = vld [vmem:[#allocation5 + $0xb8] sm:$0xff] }
  0x17   :  { %385 = vmatpush.msra.mxu3 %v120_v19  ;;  %366 = vmatpush.msra.mxu2 %v103_v21  ;;  %v116_v35 = vld [vmem:[#allocation5 + $0x1b8] sm:$0xff]  ;;  %v67_v36 = vld [vmem:[#allocation5 + $0x30] sm:$0xff]  ;;  %v66_v40 = vld [vmem:[#allocation5 + $0x28] sm:$0xff] }
  0x18   :  { %346 = vmatpush.msra.mxu1 %v87_v22  ;;  %327 = vmatpush.msra.mxu0 %v70_v24  ;;  %v99_v37 = vld [vmem:[#allocation5 + $0x130] sm:$0xff]  ;;  %v98_v41 = vld [vmem:[#allocation5 + $0x128] sm:$0xff]  ;;  %v65_v44 = vld [vmem:[#allocation5 + $0x20] sm:$0xff] }
  0x19   :  { %386 = vmatpush.msra.mxu3 %v119_v23  ;;  %367 = vmatpush.msra.mxu2 %v102_v25  ;;  %v83_v38 = vld [vmem:[#allocation5 + $0xb0] sm:$0xff]  ;;  %v82_v42 = vld [vmem:[#allocation5 + $0xa8] sm:$0xff]  ;;  %v97_v45 = vld [vmem:[#allocation5 + $0x120] sm:$0xff] }
  0x1a   :  { %347 = vmatpush.msra.mxu1 %v86_v26  ;;  %328 = vmatpush.msra.mxu0 %v69_v28  ;;  %v115_v39 = vld [vmem:[#allocation5 + $0x1b0] sm:$0xff]  ;;  %v114_v43 = vld [vmem:[#allocation5 + $0x1a8] sm:$0xff]  ;;  %v81_v46 = vld [vmem:[#allocation5 + $0xa0] sm:$0xff] }
  0x1b   :  { %387 = vmatpush.msra.mxu3 %v118_v27  ;;  %368 = vmatpush.msra.mxu2 %v101_v29  ;;  %v113_v47 = vld [vmem:[#allocation5 + $0x1a0] sm:$0xff]  ;;  %v64_v48 = vld [vmem:[#allocation5 + $0x18] sm:$0xff]  ;;  %v63_v52 = vld [vmem:[#allocation5 + $0x10] sm:$0xff] }
  0x1c   :  { %348 = vmatpush.msra.mxu1 %v85_v30  ;;  %329 = vmatpush.msra.mxu0 %v68_v32  ;;  %v96_v49 = vld [vmem:[#allocation5 + $0x118] sm:$0xff]  ;;  %v95_v53 = vld [vmem:[#allocation5 + $0x110] sm:$0xff]  ;;  %v62_v56 = vld [vmem:[#allocation5 + $0x8] sm:$0xff] }
  0x1d   :  { %388 = vmatpush.msra.mxu3 %v117_v31  ;;  %369 = vmatpush.msra.mxu2 %v100_v33  ;;  %v80_v50 = vld [vmem:[#allocation5 + $0x98] sm:$0xff]  ;;  %v79_v54 = vld [vmem:[#allocation5 + $0x90] sm:$0xff]  ;;  %v94_v57 = vld [vmem:[#allocation5 + $0x108] sm:$0xff] }
  0x1e   :  { %349 = vmatpush.msra.mxu1 %v84_v34  ;;  %330 = vmatpush.msra.mxu0 %v67_v36  ;;  %v112_v51 = vld [vmem:[#allocation5 + $0x198] sm:$0xff]  ;;  %v111_v55 = vld [vmem:[#allocation5 + $0x190] sm:$0xff]  ;;  %v78_v58 = vld [vmem:[#allocation5 + $0x88] sm:$0xff] }
  0x1f   :  { %389 = vmatpush.msra.mxu3 %v116_v35  ;;  %370 = vmatpush.msra.mxu2 %v99_v37  ;;  %v110_v59 = vld [vmem:[#allocation5 + $0x188] sm:$0xff]  ;;  %v61_v60 = vld [vmem:[#allocation5] sm:$0xff]  ;;  %v140_v62 = vld [vmem:[#allocation5 + $0x278] sm:$0xff] }
  0x20   :  { %350 = vmatpush.msra.mxu1 %v83_v38  ;;  %331 = vmatpush.msra.mxu0 %v66_v40  ;;  %v93_v61 = vld [vmem:[#allocation5 + $0x100] sm:$0xff]  ;;  %v172_v63 = vld [vmem:[#allocation5 + $0x378] sm:$0xff]  ;;  %v139_v2 = vld [vmem:[#allocation5 + $0x270] sm:$0xff] }
  0x21   :  { %390 = vmatpush.msra.mxu3 %v115_v39  ;;  %371 = vmatpush.msra.mxu2 %v98_v41  ;;  %v77_v0 = vld [vmem:[#allocation5 + $0x80] sm:$0xff]  ;;  %v156_v3 = vld [vmem:[#allocation5 + $0x2f8] sm:$0xff]  ;;  %v171_v4 = vld [vmem:[#allocation5 + $0x370] sm:$0xff] }
  0x22   :  { %351 = vmatpush.msra.mxu1 %v82_v42  ;;  %332 = vmatpush.msra.mxu0 %v65_v44  ;;  %v109_v1 = vld [vmem:[#allocation5 + $0x180] sm:$0xff]  ;;  %v188_v5 = vld [vmem:[#allocation5 + $0x3f8] sm:$0xff]  ;;  %v138_v6 = vld [vmem:[#allocation5 + $0x268] sm:$0xff] }
  0x23   :  { %391 = vmatpush.msra.mxu3 %v114_v43  ;;  %372 = vmatpush.msra.mxu2 %v97_v45  ;;  %v155_v7 = vld [vmem:[#allocation5 + $0x2f0] sm:$0xff]  ;;  %v170_v8 = vld [vmem:[#allocation5 + $0x368] sm:$0xff]  ;;  %v137_v10 = vld [vmem:[#allocation5 + $0x260] sm:$0xff] }
  0x24   :  { %352 = vmatpush.msra.mxu1 %v81_v46  ;;  %333 = vmatpush.msra.mxu0 %v64_v48  ;;  %v187_v9 = vld [vmem:[#allocation5 + $0x3f0] sm:$0xff]  ;;  %v154_v11 = vld [vmem:[#allocation5 + $0x2e8] sm:$0xff]  ;;  %v169_v12 = vld [vmem:[#allocation5 + $0x360] sm:$0xff] }
  0x25   :  { %392 = vmatpush.msra.mxu3 %v113_v47  ;;  %373 = vmatpush.msra.mxu2 %v96_v49  ;;  %v186_v13 = vld [vmem:[#allocation5 + $0x3e8] sm:$0xff]  ;;  %v136_v14 = vld [vmem:[#allocation5 + $0x258] sm:$0xff]  ;;  %v153_v15 = vld [vmem:[#allocation5 + $0x2e0] sm:$0xff] }
  0x26   :  { %353 = vmatpush.msra.mxu1 %v80_v50  ;;  %334 = vmatpush.msra.mxu0 %v63_v52  ;;  %v168_v16 = vld [vmem:[#allocation5 + $0x358] sm:$0xff]  ;;  %v185_v17 = vld [vmem:[#allocation5 + $0x3e0] sm:$0xff]  ;;  %v135_v18 = vld [vmem:[#allocation5 + $0x250] sm:$0xff] }
  0x27   :  { %393 = vmatpush.msra.mxu3 %v112_v51  ;;  %374 = vmatpush.msra.mxu2 %v95_v53  ;;  %v152_v19 = vld [vmem:[#allocation5 + $0x2d8] sm:$0xff]  ;;  %v167_v20 = vld [vmem:[#allocation5 + $0x350] sm:$0xff]  ;;  %v134_v22 = vld [vmem:[#allocation5 + $0x248] sm:$0xff] }
  0x28   :  { %354 = vmatpush.msra.mxu1 %v79_v54  ;;  %335 = vmatpush.msra.mxu0 %v62_v56  ;;  %v184_v21 = vld [vmem:[#allocation5 + $0x3d8] sm:$0xff]  ;;  %v151_v23 = vld [vmem:[#allocation5 + $0x2d0] sm:$0xff]  ;;  %v166_v24 = vld [vmem:[#allocation5 + $0x348] sm:$0xff] }
  0x29   :  { %394 = vmatpush.msra.mxu3 %v111_v55  ;;  %375 = vmatpush.msra.mxu2 %v94_v57  ;;  %v183_v25 = vld [vmem:[#allocation5 + $0x3d0] sm:$0xff]  ;;  %v133_v26 = vld [vmem:[#allocation5 + $0x240] sm:$0xff]  ;;  %v150_v27 = vld [vmem:[#allocation5 + $0x2c8] sm:$0xff] }
  0x2a   :  { %355 = vmatpush.msra.mxu1 %v78_v58  ;;  %336 = vmatpush.msra.mxu0 %v61_v60  ;;  %v165_v28 = vld [vmem:[#allocation5 + $0x340] sm:$0xff]  ;;  %v182_v29 = vld [vmem:[#allocation5 + $0x3c8] sm:$0xff]  ;;  %v132_v30 = vld [vmem:[#allocation5 + $0x238] sm:$0xff] }
  0x2b   :  { %395 = vmatpush.msra.mxu3 %v110_v59  ;;  %376 = vmatpush.msra.mxu2 %v93_v61  ;;  %v149_v31 = vld [vmem:[#allocation5 + $0x2c0] sm:$0xff]  ;;  %v164_v32 = vld [vmem:[#allocation5 + $0x338] sm:$0xff]  ;;  %v131_v34 = vld [vmem:[#allocation5 + $0x230] sm:$0xff] }
  0x2c   :  { %401 = vmatpush.msrb.mxu0 %v140_v62  ;;  %356 = vmatpush.msra.mxu1 %v77_v0  ;;  %v181_v33 = vld [vmem:[#allocation5 + $0x3c0] sm:$0xff]  ;;  %v148_v35 = vld [vmem:[#allocation5 + $0x2b8] sm:$0xff]  ;;  %v163_v36 = vld [vmem:[#allocation5 + $0x330] sm:$0xff] }
  0x2d   :  { %441 = vmatpush.msrb.mxu2 %v172_v63  ;;  %396 = vmatpush.msra.mxu3 %v109_v1  ;;  %v180_v37 = vld [vmem:[#allocation5 + $0x3b8] sm:$0xff]  ;;  %v130_v38 = vld [vmem:[#allocation5 + $0x228] sm:$0xff]  ;;  %v147_v39 = vld [vmem:[#allocation5 + $0x2b0] sm:$0xff] }
  0x2e   :  { %402 = vmatpush.msrb.mxu0 %v139_v2  ;;  %421 = vmatpush.msrb.mxu1 %v156_v3  ;;  %v162_v40 = vld [vmem:[#allocation5 + $0x328] sm:$0xff]  ;;  %v179_v41 = vld [vmem:[#allocation5 + $0x3b0] sm:$0xff]  ;;  %v129_v42 = vld [vmem:[#allocation5 + $0x220] sm:$0xff] }
  0x2f   :  { %442 = vmatpush.msrb.mxu2 %v171_v4  ;;  %461 = vmatpush.msrb.mxu3 %v188_v5  ;;  %v146_v43 = vld [vmem:[#allocation5 + $0x2a8] sm:$0xff]  ;;  %v161_v44 = vld [vmem:[#allocation5 + $0x320] sm:$0xff]  ;;  %v128_v46 = vld [vmem:[#allocation5 + $0x218] sm:$0xff] }
  0x30   :  { %403 = vmatpush.msrb.mxu0 %v138_v6  ;;  %422 = vmatpush.msrb.mxu1 %v155_v7  ;;  %v178_v45 = vld [vmem:[#allocation5 + $0x3a8] sm:$0xff]  ;;  %v145_v47 = vld [vmem:[#allocation5 + $0x2a0] sm:$0xff]  ;;  %v160_v48 = vld [vmem:[#allocation5 + $0x318] sm:$0xff] }
  0x31   :  { %443 = vmatpush.msrb.mxu2 %v170_v8  ;;  %462 = vmatpush.msrb.mxu3 %v187_v9  ;;  %v177_v49 = vld [vmem:[#allocation5 + $0x3a0] sm:$0xff]  ;;  %v127_v50 = vld [vmem:[#allocation5 + $0x210] sm:$0xff]  ;;  %v144_v51 = vld [vmem:[#allocation5 + $0x298] sm:$0xff] }
  0x32   :  { %404 = vmatpush.msrb.mxu0 %v137_v10  ;;  %423 = vmatpush.msrb.mxu1 %v154_v11  ;;  %v159_v52 = vld [vmem:[#allocation5 + $0x310] sm:$0xff]  ;;  %v176_v53 = vld [vmem:[#allocation5 + $0x398] sm:$0xff]  ;;  %v126_v54 = vld [vmem:[#allocation5 + $0x208] sm:$0xff] }
  0x33   :  { %444 = vmatpush.msrb.mxu2 %v169_v12  ;;  %463 = vmatpush.msrb.mxu3 %v186_v13  ;;  %v143_v55 = vld [vmem:[#allocation5 + $0x290] sm:$0xff]  ;;  %v158_v56 = vld [vmem:[#allocation5 + $0x308] sm:$0xff]  ;;  %v125_v58 = vld [vmem:[#allocation5 + $0x200] sm:$0xff] }
  0x34   :  { %405 = vmatpush.msrb.mxu0 %v136_v14  ;;  %424 = vmatpush.msrb.mxu1 %v153_v15  ;;  %v175_v57 = vld [vmem:[#allocation5 + $0x390] sm:$0xff]  ;;  %v142_v59 = vld [vmem:[#allocation5 + $0x288] sm:$0xff]  ;;  %v157_v60 = vld [vmem:[#allocation5 + $0x300] sm:$0xff] }
  0x35   :  { %445 = vmatpush.msrb.mxu2 %v168_v16  ;;  %464 = vmatpush.msrb.mxu3 %v185_v17  ;;  %v174_v61 = vld [vmem:[#allocation5 + $0x388] sm:$0xff]  ;;  %v45_v62 = vld [vmem:[#allocation2] sm:$0xff]  ;;  %v47_v63 = vld [vmem:[#allocation2 + $0x10] sm:$0xff] }
  0x36   :  { %406 = vmatpush.msrb.mxu0 %v135_v18  ;;  %425 = vmatpush.msrb.mxu1 %v152_v19  ;;  %v204_v0 = vld [vmem:[#allocation5 + $0x478] sm:$0xff]  ;;  %v141_v2 = vld [vmem:[#allocation5 + $0x280] sm:$0xff]  ;;  %v46_v4 = vld [vmem:[#allocation2 + $0x8] sm:$0xff] }
  0x37   :  { %446 = vmatpush.msrb.mxu2 %v167_v20  ;;  %465 = vmatpush.msrb.mxu3 %v184_v21  ;;  %v236_v1 = vld [vmem:[#allocation5 + $0x578] sm:$0xff]  ;;  %v173_v3 = vld [vmem:[#allocation5 + $0x380] sm:$0xff]  ;;  %v203_v6 = vld [vmem:[#allocation5 + $0x470] sm:$0xff] }
  0x38   :  { %407 = vmatpush.msrb.mxu0 %v134_v22  ;;  %426 = vmatpush.msrb.mxu1 %v151_v23  ;;  %v48_v5 = vld [vmem:[#allocation2 + $0x18] sm:$0xff]  ;;  %v235_v8 = vld [vmem:[#allocation5 + $0x570] sm:$0xff]  ;;  %v202_v10 = vld [vmem:[#allocation5 + $0x468] sm:$0xff] }
  0x39   :  { %447 = vmatpush.msrb.mxu2 %v166_v24  ;;  %466 = vmatpush.msrb.mxu3 %v183_v25  ;;  %v220_v7 = vld [vmem:[#allocation5 + $0x4f8] sm:$0xff]  ;;  %v219_v11 = vld [vmem:[#allocation5 + $0x4f0] sm:$0xff]  ;;  %v234_v12 = vld [vmem:[#allocation5 + $0x568] sm:$0xff] }
  0x3a   :  { %408 = vmatpush.msrb.mxu0 %v133_v26  ;;  %427 = vmatpush.msrb.mxu1 %v150_v27  ;;  %v252_v9 = vld [vmem:[#allocation5 + $0x5f8] sm:$0xff]  ;;  %v251_v13 = vld [vmem:[#allocation5 + $0x5f0] sm:$0xff]  ;;  %v201_v14 = vld [vmem:[#allocation5 + $0x460] sm:$0xff] }
  0x3b   :  { %448 = vmatpush.msrb.mxu2 %v165_v28  ;;  %467 = vmatpush.msrb.mxu3 %v182_v29  ;;  %v218_v15 = vld [vmem:[#allocation5 + $0x4e8] sm:$0xff]  ;;  %v233_v16 = vld [vmem:[#allocation5 + $0x560] sm:$0xff]  ;;  %v51_v18 = vld [vmem:[#allocation2 + $0x30] sm:$0xff] }
  0x3c   :  { %409 = vmatpush.msrb.mxu0 %v132_v30  ;;  %428 = vmatpush.msrb.mxu1 %v149_v31  ;;  %v250_v17 = vld [vmem:[#allocation5 + $0x5e8] sm:$0xff]  ;;  %v200_v19 = vld [vmem:[#allocation5 + $0x458] sm:$0xff]  ;;  %v217_v20 = vld [vmem:[#allocation5 + $0x4e0] sm:$0xff] }
  0x3d   :  { %449 = vmatpush.msrb.mxu2 %v164_v32  ;;  %468 = vmatpush.msrb.mxu3 %v181_v33  ;;  %v232_v21 = vld [vmem:[#allocation5 + $0x558] sm:$0xff]  ;;  %v249_v22 = vld [vmem:[#allocation5 + $0x5e0] sm:$0xff]  ;;  %v199_v25 = vld [vmem:[#allocation5 + $0x450] sm:$0xff] }
  0x3e   :  { %410 = vmatpush.msrb.mxu0 %v131_v34  ;;  %429 = vmatpush.msrb.mxu1 %v148_v35  ;;  %v49_v23 = vld [vmem:[#allocation2 + $0x20] sm:$0xff]  ;;  %v52_v24 = vld [vmem:[#allocation2 + $0x38] sm:$0xff]  ;;  %v231_v27 = vld [vmem:[#allocation5 + $0x550] sm:$0xff] }
  0x3f   :  { %450 = vmatpush.msrb.mxu2 %v163_v36  ;;  %469 = vmatpush.msrb.mxu3 %v180_v37  ;;  %v216_v26 = vld [vmem:[#allocation5 + $0x4d8] sm:$0xff]  ;;  %v50_v29 = vld [vmem:[#allocation2 + $0x28] sm:$0xff]  ;;  %v215_v31 = vld [vmem:[#allocation5 + $0x4d0] sm:$0xff] }
  0x40   :  { %411 = vmatpush.msrb.mxu0 %v130_v38  ;;  %430 = vmatpush.msrb.mxu1 %v147_v39  ;;  %v248_v28 = vld [vmem:[#allocation5 + $0x5d8] sm:$0xff]  ;;  %v198_v30 = vld [vmem:[#allocation5 + $0x448] sm:$0xff]  ;;  %v247_v33 = vld [vmem:[#allocation5 + $0x5d0] sm:$0xff] }
  0x41   :  { %451 = vmatpush.msrb.mxu2 %v162_v40  ;;  %470 = vmatpush.msrb.mxu3 %v179_v41  ;;  %v230_v32 = vld [vmem:[#allocation5 + $0x548] sm:$0xff]  ;;  %v197_v34 = vld [vmem:[#allocation5 + $0x440] sm:$0xff]  ;;  %v196_v38 = vld [vmem:[#allocation5 + $0x438] sm:$0xff] }
  0x42   :  { %412 = vmatpush.msrb.mxu0 %v129_v42  ;;  %431 = vmatpush.msrb.mxu1 %v146_v43  ;;  %v214_v35 = vld [vmem:[#allocation5 + $0x4c8] sm:$0xff]  ;;  %v229_v36 = vld [vmem:[#allocation5 + $0x540] sm:$0xff]  ;;  %v228_v40 = vld [vmem:[#allocation5 + $0x538] sm:$0xff] }
  0x43   :  { %452 = vmatpush.msrb.mxu2 %v161_v44  ;;  %471 = vmatpush.msrb.mxu3 %v178_v45  ;;  %v246_v37 = vld [vmem:[#allocation5 + $0x5c8] sm:$0xff]  ;;  %v213_v39 = vld [vmem:[#allocation5 + $0x4c0] sm:$0xff]  ;;  %v195_v42 = vld [vmem:[#allocation5 + $0x430] sm:$0xff] }
  0x44   :  { %413 = vmatpush.msrb.mxu0 %v128_v46  ;;  %432 = vmatpush.msrb.mxu1 %v145_v47  ;;  %v245_v41 = vld [vmem:[#allocation5 + $0x5c0] sm:$0xff]  ;;  %v212_v43 = vld [vmem:[#allocation5 + $0x4b8] sm:$0xff]  ;;  %v227_v44 = vld [vmem:[#allocation5 + $0x530] sm:$0xff] }
  0x45   :  { %453 = vmatpush.msrb.mxu2 %v160_v48  ;;  %472 = vmatpush.msrb.mxu3 %v177_v49  ;;  %v244_v45 = vld [vmem:[#allocation5 + $0x5b8] sm:$0xff]  ;;  %v194_v46 = vld [vmem:[#allocation5 + $0x428] sm:$0xff]  ;;  %v211_v47 = vld [vmem:[#allocation5 + $0x4b0] sm:$0xff] }
  0x46   :  { %414 = vmatpush.msrb.mxu0 %v127_v50  ;;  %433 = vmatpush.msrb.mxu1 %v144_v51  ;;  %v226_v48 = vld [vmem:[#allocation5 + $0x528] sm:$0xff]  ;;  %v243_v49 = vld [vmem:[#allocation5 + $0x5b0] sm:$0xff]  ;;  %v193_v50 = vld [vmem:[#allocation5 + $0x420] sm:$0xff] }
  0x47   :  { %454 = vmatpush.msrb.mxu2 %v159_v52  ;;  %473 = vmatpush.msrb.mxu3 %v176_v53  ;;  %v210_v51 = vld [vmem:[#allocation5 + $0x4a8] sm:$0xff]  ;;  %v225_v52 = vld [vmem:[#allocation5 + $0x520] sm:$0xff] }
  0x48   :  { %415 = vmatpush.msrb.mxu0 %v126_v54  ;;  %434 = vmatpush.msrb.mxu1 %v143_v55  ;;  %v242_v53 = vld [vmem:[#allocation5 + $0x5a8] sm:$0xff]  ;;  %v192_v54 = vld [vmem:[#allocation5 + $0x418] sm:$0xff]  ;;  %v209_v55 = vld [vmem:[#allocation5 + $0x4a0] sm:$0xff] }
  0x49   :  { %455 = vmatpush.msrb.mxu2 %v158_v56  ;;  %474 = vmatpush.msrb.mxu3 %v175_v57  ;;  %v224_v56 = vld [vmem:[#allocation5 + $0x518] sm:$0xff]  ;;  %v241_v57 = vld [vmem:[#allocation5 + $0x5a0] sm:$0xff] }
  0x4a   :  { %416 = vmatpush.msrb.mxu0 %v125_v58  ;;  %435 = vmatpush.msrb.mxu1 %v142_v59  ;;  %v191_v58 = vld [vmem:[#allocation5 + $0x410] sm:$0xff]  ;;  %v208_v59 = vld [vmem:[#allocation5 + $0x498] sm:$0xff] }
  0x4b   :  { %456 = vmatpush.msrb.mxu2 %v157_v60  ;;  %475 = vmatpush.msrb.mxu3 %v174_v61  ;;  %v223_v60 = vld [vmem:[#allocation5 + $0x510] sm:$0xff]  ;;  %v240_v61 = vld [vmem:[#allocation5 + $0x598] sm:$0xff] }
  0x4c   :  { %337 = vmatmul.f32.vlgmr.msra.gmra.mxu0 %v45_v62  ;;  %377 = vmatmul.f32.vlgmr.msra.gmra.mxu2 %v47_v63  ;;  %v190_v62 = vld [vmem:[#allocation5 + $0x408] sm:$0xff]  ;;  %v207_v63 = vld [vmem:[#allocation5 + $0x490] sm:$0xff] }
  0x4d   :  { %481 = vmatpush.msra.mxu0 %v204_v0  ;;  %521 = vmatpush.msra.mxu2 %v236_v1  ;;  %v222_v0 = vld [vmem:[#allocation5 + $0x508] sm:$0xff]  ;;  %v239_v1 = vld [vmem:[#allocation5 + $0x590] sm:$0xff] }
  0x4e   :  { %436 = vmatpush.msrb.mxu1 %v141_v2  ;;  %476 = vmatpush.msrb.mxu3 %v173_v3  ;;  %v189_v2 = vld [vmem:[#allocation5 + $0x400] sm:$0xff]  ;;  %v206_v3 = vld [vmem:[#allocation5 + $0x488] sm:$0xff] }
  0x4f   :  { %357 = vmatmul.f32.vlgmr.msra.gmra.mxu1 %v46_v4  ;;  %397 = vmatmul.f32.vlgmr.msra.gmra.mxu3 %v48_v5  ;;  %v221_v4 = vld [vmem:[#allocation5 + $0x500] sm:$0xff]  ;;  %v238_v5 = vld [vmem:[#allocation5 + $0x588] sm:$0xff] }
  0x50   :  { %482 = vmatpush.msra.mxu0 %v203_v6  ;;  %501 = vmatpush.msra.mxu1 %v220_v7  ;;  %v53_v6 = vld [vmem:[#allocation2 + $0x40] sm:$0xff]  ;;  %v55_v7 = vld [vmem:[#allocation2 + $0x50] sm:$0xff] }
  0x51   :  { %522 = vmatpush.msra.mxu2 %v235_v8  ;;  %541 = vmatpush.msra.mxu3 %v252_v9  ;;  %v268_v8 = vld [vmem:[#allocation5 + $0x678] sm:$0xff] }
  0x52   :  { %483 = vmatpush.msra.mxu0 %v202_v10  ;;  %502 = vmatpush.msra.mxu1 %v219_v11  ;;  %v300_v9 = vld [vmem:[#allocation5 + $0x778] sm:$0xff]  ;;  %v205_v10 = vld [vmem:[#allocation5 + $0x480] sm:$0xff] }
  0x53   :  { %523 = vmatpush.msra.mxu2 %v234_v12  ;;  %542 = vmatpush.msra.mxu3 %v251_v13  ;;  %v237_v11 = vld [vmem:[#allocation5 + $0x580] sm:$0xff]  ;;  %v54_v12 = vld [vmem:[#allocation2 + $0x48] sm:$0xff]  ;;  %v56_v13 = vld [vmem:[#allocation2 + $0x58] sm:$0xff] }
  0x54   :  { %484 = vmatpush.msra.mxu0 %v201_v14  ;;  %503 = vmatpush.msra.mxu1 %v218_v15  ;;  %v267_v14 = vld [vmem:[#allocation5 + $0x670] sm:$0xff]  ;;  %v284_v15 = vld [vmem:[#allocation5 + $0x6f8] sm:$0xff] }
  0x55   :  { %524 = vmatpush.msra.mxu2 %v233_v16  ;;  %543 = vmatpush.msra.mxu3 %v250_v17  ;;  %v299_v16 = vld [vmem:[#allocation5 + $0x770] sm:$0xff]  ;;  %v316_v17 = vld [vmem:[#allocation5 + $0x7f8] sm:$0xff] }
  0x56   :  { %457 = vmatmul.f32.vlgmr.msrb.gmra.mxu2 %v51_v18  ;;  %485 = vmatpush.msra.mxu0 %v200_v19  ;;  %v266_v18 = vld [vmem:[#allocation5 + $0x668] sm:$0xff]  ;;  %v283_v19 = vld [vmem:[#allocation5 + $0x6f0] sm:$0xff] }
  0x57   :  { %504 = vmatpush.msra.mxu1 %v217_v20  ;;  %525 = vmatpush.msra.mxu2 %v232_v21  ;;  %v298_v20 = vld [vmem:[#allocation5 + $0x768] sm:$0xff]  ;;  %v315_v21 = vld [vmem:[#allocation5 + $0x7f0] sm:$0xff] }
  0x58   :  { %544 = vmatpush.msra.mxu3 %v249_v22  ;;  %417 = vmatmul.f32.vlgmr.msrb.gmra.mxu0 %v49_v23  ;;  %v265_v22 = vld [vmem:[#allocation5 + $0x660] sm:$0xff]  ;;  %v282_v23 = vld [vmem:[#allocation5 + $0x6e8] sm:$0xff] }
  0x59   :  { %477 = vmatmul.f32.vlgmr.msrb.gmra.mxu3 %v52_v24  ;;  %486 = vmatpush.msra.mxu0 %v199_v25  ;;  %v297_v24 = vld [vmem:[#allocation5 + $0x760] sm:$0xff]  ;;  %v314_v25 = vld [vmem:[#allocation5 + $0x7e8] sm:$0xff] }
  0x5a   :  { %505 = vmatpush.msra.mxu1 %v216_v26  ;;  %526 = vmatpush.msra.mxu2 %v231_v27  ;;  %v264_v26 = vld [vmem:[#allocation5 + $0x658] sm:$0xff]  ;;  %v281_v27 = vld [vmem:[#allocation5 + $0x6e0] sm:$0xff] }
  0x5b   :  { %545 = vmatpush.msra.mxu3 %v248_v28  ;;  %437 = vmatmul.f32.vlgmr.msrb.gmra.mxu1 %v50_v29  ;;  %v296_v28 = vld [vmem:[#allocation5 + $0x758] sm:$0xff]  ;;  %v313_v29 = vld [vmem:[#allocation5 + $0x7e0] sm:$0xff] }
  0x5c   :  { %487 = vmatpush.msra.mxu0 %v198_v30  ;;  %506 = vmatpush.msra.mxu1 %v215_v31  ;;  %v263_v30 = vld [vmem:[#allocation5 + $0x650] sm:$0xff]  ;;  %v280_v31 = vld [vmem:[#allocation5 + $0x6d8] sm:$0xff] }
  0x5d   :  { %527 = vmatpush.msra.mxu2 %v230_v32  ;;  %546 = vmatpush.msra.mxu3 %v247_v33  ;;  %v295_v32 = vld [vmem:[#allocation5 + $0x750] sm:$0xff]  ;;  %v312_v33 = vld [vmem:[#allocation5 + $0x7d8] sm:$0xff] }
  0x5e   :  { %488 = vmatpush.msra.mxu0 %v197_v34  ;;  %507 = vmatpush.msra.mxu1 %v214_v35  ;;  %v262_v34 = vld [vmem:[#allocation5 + $0x648] sm:$0xff]  ;;  %v279_v35 = vld [vmem:[#allocation5 + $0x6d0] sm:$0xff] }
  0x5f   :  { %528 = vmatpush.msra.mxu2 %v229_v36  ;;  %547 = vmatpush.msra.mxu3 %v246_v37  ;;  %v294_v36 = vld [vmem:[#allocation5 + $0x748] sm:$0xff]  ;;  %v311_v37 = vld [vmem:[#allocation5 + $0x7d0] sm:$0xff] }
  0x60   :  { %489 = vmatpush.msra.mxu0 %v196_v38  ;;  %508 = vmatpush.msra.mxu1 %v213_v39  ;;  %v261_v38 = vld [vmem:[#allocation5 + $0x640] sm:$0xff]  ;;  %v278_v39 = vld [vmem:[#allocation5 + $0x6c8] sm:$0xff] }
  0x61   :  { %529 = vmatpush.msra.mxu2 %v228_v40  ;;  %548 = vmatpush.msra.mxu3 %v245_v41  ;;  %v293_v40 = vld [vmem:[#allocation5 + $0x740] sm:$0xff]  ;;  %v310_v41 = vld [vmem:[#allocation5 + $0x7c8] sm:$0xff] }
  0x62   :  { %490 = vmatpush.msra.mxu0 %v195_v42  ;;  %509 = vmatpush.msra.mxu1 %v212_v43  ;;  %v260_v42 = vld [vmem:[#allocation5 + $0x638] sm:$0xff]  ;;  %v277_v43 = vld [vmem:[#allocation5 + $0x6c0] sm:$0xff] }
  0x63   :  { %530 = vmatpush.msra.mxu2 %v227_v44  ;;  %549 = vmatpush.msra.mxu3 %v244_v45  ;;  %v292_v44 = vld [vmem:[#allocation5 + $0x738] sm:$0xff]  ;;  %v309_v45 = vld [vmem:[#allocation5 + $0x7c0] sm:$0xff] }
  0x64   :  { %491 = vmatpush.msra.mxu0 %v194_v46  ;;  %510 = vmatpush.msra.mxu1 %v211_v47  ;;  %v259_v46 = vld [vmem:[#allocation5 + $0x630] sm:$0xff]  ;;  %v276_v47 = vld [vmem:[#allocation5 + $0x6b8] sm:$0xff] }
  0x65   :  { %531 = vmatpush.msra.mxu2 %v226_v48  ;;  %550 = vmatpush.msra.mxu3 %v243_v49  ;;  %v291_v48 = vld [vmem:[#allocation5 + $0x730] sm:$0xff]  ;;  %v308_v49 = vld [vmem:[#allocation5 + $0x7b8] sm:$0xff] }
  0x66   :  { %492 = vmatpush.msra.mxu0 %v193_v50  ;;  %511 = vmatpush.msra.mxu1 %v210_v51  ;;  %v258_v50 = vld [vmem:[#allocation5 + $0x628] sm:$0xff]  ;;  %v275_v51 = vld [vmem:[#allocation5 + $0x6b0] sm:$0xff] }
  0x67   :  { %532 = vmatpush.msra.mxu2 %v225_v52  ;;  %551 = vmatpush.msra.mxu3 %v242_v53  ;;  %v290_v52 = vld [vmem:[#allocation5 + $0x728] sm:$0xff]  ;;  %v307_v53 = vld [vmem:[#allocation5 + $0x7b0] sm:$0xff] }
  0x68   :  { %493 = vmatpush.msra.mxu0 %v192_v54  ;;  %512 = vmatpush.msra.mxu1 %v209_v55  ;;  %v257_v54 = vld [vmem:[#allocation5 + $0x620] sm:$0xff]  ;;  %v274_v55 = vld [vmem:[#allocation5 + $0x6a8] sm:$0xff] }
  0x69   :  { %533 = vmatpush.msra.mxu2 %v224_v56  ;;  %552 = vmatpush.msra.mxu3 %v241_v57  ;;  %v289_v56 = vld [vmem:[#allocation5 + $0x720] sm:$0xff]  ;;  %v306_v57 = vld [vmem:[#allocation5 + $0x7a8] sm:$0xff] }
  0x6a   :  { %494 = vmatpush.msra.mxu0 %v191_v58  ;;  %513 = vmatpush.msra.mxu1 %v208_v59  ;;  %v256_v58 = vld [vmem:[#allocation5 + $0x618] sm:$0xff]  ;;  %v273_v59 = vld [vmem:[#allocation5 + $0x6a0] sm:$0xff] }
  0x6b   :  { %534 = vmatpush.msra.mxu2 %v223_v60  ;;  %553 = vmatpush.msra.mxu3 %v240_v61  ;;  %v288_v60 = vld [vmem:[#allocation5 + $0x718] sm:$0xff]  ;;  %v305_v61 = vld [vmem:[#allocation5 + $0x7a0] sm:$0xff] }
  0x6c   :  { %495 = vmatpush.msra.mxu0 %v190_v62  ;;  %514 = vmatpush.msra.mxu1 %v207_v63  ;;  %v255_v62 = vld [vmem:[#allocation5 + $0x610] sm:$0xff]  ;;  %v272_v63 = vld [vmem:[#allocation5 + $0x698] sm:$0xff] }
  0x6d   :  { %535 = vmatpush.msra.mxu2 %v222_v0  ;;  %554 = vmatpush.msra.mxu3 %v239_v1  ;;  %v287_v0 = vld [vmem:[#allocation5 + $0x710] sm:$0xff]  ;;  %v304_v1 = vld [vmem:[#allocation5 + $0x798] sm:$0xff] }
  0x6e   :  { %496 = vmatpush.msra.mxu0 %v189_v2  ;;  %515 = vmatpush.msra.mxu1 %v206_v3  ;;  %v254_v2 = vld [vmem:[#allocation5 + $0x608] sm:$0xff]  ;;  %v271_v3 = vld [vmem:[#allocation5 + $0x690] sm:$0xff] }
  0x6f   :  { %536 = vmatpush.msra.mxu2 %v221_v4  ;;  %555 = vmatpush.msra.mxu3 %v238_v5  ;;  %v286_v4 = vld [vmem:[#allocation5 + $0x708] sm:$0xff]  ;;  %v303_v5 = vld [vmem:[#allocation5 + $0x790] sm:$0xff] }
  0x70   :  { %497 = vmatmul.f32.vlgmr.msra.gmra.mxu0 %v53_v6  ;;  %537 = vmatmul.f32.vlgmr.msra.gmra.mxu2 %v55_v7  ;;  %v253_v6 = vld [vmem:[#allocation5 + $0x600] sm:$0xff]  ;;  %v270_v7 = vld [vmem:[#allocation5 + $0x688] sm:$0xff] }
  0x71   :  { %561 = vmatpush.msrb.mxu0 %v268_v8  ;;  %601 = vmatpush.msrb.mxu2 %v300_v9  ;;  %v285_v8 = vld [vmem:[#allocation5 + $0x700] sm:$0xff]  ;;  %v302_v9 = vld [vmem:[#allocation5 + $0x788] sm:$0xff] }
  0x72   :  { %516 = vmatpush.msra.mxu1 %v205_v10  ;;  %556 = vmatpush.msra.mxu3 %v237_v11  ;;  %v57_v10 = vld [vmem:[#allocation2 + $0x60] sm:$0xff]  ;;  %v59_v11 = vld [vmem:[#allocation2 + $0x70] sm:$0xff] }
  0x73   :  { %517 = vmatmul.f32.vlgmr.msra.gmra.mxu1 %v54_v12  ;;  %557 = vmatmul.f32.vlgmr.msra.gmra.mxu3 %v56_v13  ;;  %v269_v12 = vld [vmem:[#allocation5 + $0x680] sm:$0xff] }
  0x74   :  { %562 = vmatpush.msrb.mxu0 %v267_v14  ;;  %581 = vmatpush.msrb.mxu1 %v284_v15  ;;  %v301_v13 = vld [vmem:[#allocation5 + $0x780] sm:$0xff]  ;;  %v58_v14 = vld [vmem:[#allocation2 + $0x68] sm:$0xff]  ;;  %v60_v15 = vld [vmem:[#allocation2 + $0x78] sm:$0xff] }
  0x75   :  { %602 = vmatpush.msrb.mxu2 %v299_v16  ;;  %621 = vmatpush.msrb.mxu3 %v316_v17  ;;  %v665_v16 = vld [vmem:[%s783_s2] ss:$0 sm:$0xff]  ;;  %s748_s2 = smov [#allocation7]  }
  0x76   :  { %563 = vmatpush.msrb.mxu0 %v266_v18  ;;  %582 = vmatpush.msrb.mxu1 %v283_v19  ;;  %s647_s24 = sshll.u32 %s748_s2, 4  ;;  %s648_s24 = int_to_ptr.vmem [resolvable:$true] %s647_s24 }
  0x77   :  { %603 = vmatpush.msrb.mxu2 %v298_v20  ;;  %622 = vmatpush.msrb.mxu3 %v315_v21 }
  0x78   :  { %564 = vmatpush.msrb.mxu0 %v265_v22  ;;  %583 = vmatpush.msrb.mxu1 %v282_v23 }
  0x79   :  { %604 = vmatpush.msrb.mxu2 %v297_v24  ;;  %623 = vmatpush.msrb.mxu3 %v314_v25 }
  0x7a   :  { %565 = vmatpush.msrb.mxu0 %v264_v26  ;;  %584 = vmatpush.msrb.mxu1 %v281_v27 }
  0x7b   :  { %605 = vmatpush.msrb.mxu2 %v296_v28  ;;  %624 = vmatpush.msrb.mxu3 %v313_v29 }
  0x7c   :  { %566 = vmatpush.msrb.mxu0 %v263_v30  ;;  %585 = vmatpush.msrb.mxu1 %v280_v31 }
  0x7d   :  { %606 = vmatpush.msrb.mxu2 %v295_v32  ;;  %625 = vmatpush.msrb.mxu3 %v312_v33 }
  0x7e   :  { %567 = vmatpush.msrb.mxu0 %v262_v34  ;;  %586 = vmatpush.msrb.mxu1 %v279_v35 }
  0x7f   :  { %607 = vmatpush.msrb.mxu2 %v294_v36  ;;  %626 = vmatpush.msrb.mxu3 %v311_v37 }
  0x80   :  { %568 = vmatpush.msrb.mxu0 %v261_v38  ;;  %587 = vmatpush.msrb.mxu1 %v278_v39 }
  0x81   :  { %608 = vmatpush.msrb.mxu2 %v293_v40  ;;  %627 = vmatpush.msrb.mxu3 %v310_v41 }
  0x82   :  { %569 = vmatpush.msrb.mxu0 %v260_v42  ;;  %588 = vmatpush.msrb.mxu1 %v277_v43 }
  0x83   :  { %609 = vmatpush.msrb.mxu2 %v292_v44  ;;  %628 = vmatpush.msrb.mxu3 %v309_v45 }
  0x84   :  { %570 = vmatpush.msrb.mxu0 %v259_v46  ;;  %589 = vmatpush.msrb.mxu1 %v276_v47 }
  0x85   :  { %610 = vmatpush.msrb.mxu2 %v291_v48  ;;  %629 = vmatpush.msrb.mxu3 %v308_v49 }
  0x86   :  { %571 = vmatpush.msrb.mxu0 %v258_v50  ;;  %590 = vmatpush.msrb.mxu1 %v275_v51 }
  0x87   :  { %611 = vmatpush.msrb.mxu2 %v290_v52  ;;  %630 = vmatpush.msrb.mxu3 %v307_v53 }
  0x88   :  { %572 = vmatpush.msrb.mxu0 %v257_v54  ;;  %591 = vmatpush.msrb.mxu1 %v274_v55 }
  0x89   :  { %612 = vmatpush.msrb.mxu2 %v289_v56  ;;  %631 = vmatpush.msrb.mxu3 %v306_v57 }
  0x8a   :  { %573 = vmatpush.msrb.mxu0 %v256_v58  ;;  %592 = vmatpush.msrb.mxu1 %v273_v59 }
  0x8b   :  { %613 = vmatpush.msrb.mxu2 %v288_v60  ;;  %632 = vmatpush.msrb.mxu3 %v305_v61 }
  0x8c   :  { %574 = vmatpush.msrb.mxu0 %v255_v62  ;;  %593 = vmatpush.msrb.mxu1 %v272_v63 }
  0x8d   :  { %614 = vmatpush.msrb.mxu2 %v287_v0  ;;  %633 = vmatpush.msrb.mxu3 %v304_v1 }
  0x8e   :  { %575 = vmatpush.msrb.mxu0 %v254_v2  ;;  %594 = vmatpush.msrb.mxu1 %v271_v3 }
  0x8f   :  { %615 = vmatpush.msrb.mxu2 %v286_v4  ;;  %634 = vmatpush.msrb.mxu3 %v303_v5 }
  0x90   :  { %576 = vmatpush.msrb.mxu0 %v253_v6  ;;  %595 = vmatpush.msrb.mxu1 %v270_v7 }
  0x91   :  { %616 = vmatpush.msrb.mxu2 %v285_v8  ;;  %635 = vmatpush.msrb.mxu3 %v302_v9 }
  0x92   :  { %577 = vmatmul.f32.vlgmr.msrb.gmra.mxu0 %v57_v10  ;;  %617 = vmatmul.f32.vlgmr.msrb.gmra.mxu2 %v59_v11 }
  0x93   :  { %596 = vmatpush.msrb.mxu1 %v269_v12  ;;  %636 = vmatpush.msrb.mxu3 %v301_v13 }
  0x94   :  { %597 = vmatmul.f32.vlgmr.msrb.gmra.mxu1 %v58_v14  ;;  %637 = vmatmul.f32.vlgmr.msrb.gmra.mxu3 %v60_v15 }
  0xc9   :  { %v338_v17 = vpop.f32.mrf.mxu0 }
  0xca   :  { %v339_v18 = vadd.f32 %v665_v16, %v338_v17 }
  0xcc   :  { %v358_v19 = vpop.f32.mrf.mxu1 }
  0xcd   :  { %v359_v20 = vadd.f32 %v358_v19, %v339_v18 }
  0xcf   :  { %v378_v21 = vpop.f32.mrf.mxu2 }
  0xd0   :  { %v379_v22 = vadd.f32 %v378_v21, %v359_v20 }
  0xd2   :  { %v398_v23 = vpop.f32.mrf.mxu3 }
  0xd3   :  { %v399_v24 = vadd.f32 %v398_v23, %v379_v22 }
  0xd5   :  { %v418_v25 = vpop.f32.mrf.mxu0 }
  0xd6   :  { %v419_v26 = vadd.f32 %v418_v25, %v399_v24 }
  0xd8   :  { %v438_v27 = vpop.f32.mrf.mxu1 }
  0xd9   :  { %v439_v28 = vadd.f32 %v438_v27, %v419_v26  ;;  %v458_v29 = vpop.f32.mrf.mxu2 }
  0xdb   :  { %v459_v30 = vadd.f32 %v458_v29, %v439_v28 }
  0xdc   :  { %v478_v31 = vpop.f32.mrf.mxu3 }
  0xdd   :  { %v479_v33 = vadd.f32 %v478_v31, %v459_v30 }
  0xed   :  { %v498_v32 = vpop.f32.mrf.mxu0 }
  0xee   :  { %v499_v34 = vadd.f32 %v498_v32, %v479_v33 }
  0xf0   :  { %v518_v35 = vpop.f32.mrf.mxu1 }
  0xf1   :  { %v519_v37 = vadd.f32 %v518_v35, %v499_v34 }
  0xf3   :  { %v538_v36 = vpop.f32.mrf.mxu2 }
  0xf4   :  { %v539_v38 = vadd.f32 %v538_v36, %v519_v37 }
  0xf6   :  { %v558_v39 = vpop.f32.mrf.mxu3 }
  0xf7   :  { %v559_v40 = vadd.f32 %v558_v39, %v539_v38 }
 0x10f   :  { %v578_v41 = vpop.f32.mrf.mxu0 }
 0x110   :  { %v579_v42 = vadd.f32 %v578_v41, %v559_v40 }
 0x111   :  { %v598_v43 = vpop.f32.mrf.mxu1 }
 0x112   :  { %v599_v44 = vadd.f32 %v598_v43, %v579_v42 }
 0x115   :  { %v618_v45 = vpop.f32.mrf.mxu2 }
 0x116   :  { %v619_v46 = vadd.f32 %v618_v45, %v599_v44 }
 0x117   :  { %v638_v47 = vpop.f32.mrf.mxu3 }
 0x118   :  { %v639_v48 = vadd.f32 %v638_v47, %v619_v46 }
 0x11a   :  { %641 = vst [vmem:[#allocation7] sm:$0xff] %v639_v48 }
 0x11b   :  { %652 = dma.vmem_to_hbm [thread:$0]  %s648_s24, 128, %s650_s27, [#allocation4]  }
 0x11c   :  { %742 = dma.done.wait [#allocation4], 128  }
 0x11d   :  { %743 = vsyncadd [#allocation4], 4294967168 }
 0x11e   :  { %657 = vsyncpa [#allocation3], 1 }
 0x11f   :  { %658 = vsyncpa [#allocation6], 1 }
 0x120   :  { %659 = vsyncpa [#allocation4], 1 }

</bundles_post_ra>
